<compile_context>
chip_gen: v6e
topology: v6e:2x2x1
jax: 0.10.0
libtpu: 0.0.40
codegen_flags: <defaults>
</compile_context>

<pallas_src>
import numpy as np
import jax
import jax.numpy as jnp
from jax import lax
from jax.experimental import pallas as pl
from jax.experimental.pallas import tpu as pltpu

LANE = 128
TARGET_TILE_HW = 65536     # lanes per grid step (~3.4 MiB of blocks; fits every gen)

# Reduced-record row layout (sublane axis of the (N, 16, 1) output)
RED_ROWS = 16
ROW_QUAT = 0               # rows 0..3
ROW_SCL = 4                # rows 4..6
ROW_Z = 7                  # row  7
ROW_MSIZE = 8              # row  8


def _round_up(x, m):
    return ((x + m - 1) // m) * m


def _choose_tiling(hw):
    """Pick (hw_pad, tile) so tile | hw_pad, tile % 128 == 0, with no padding
    whenever a reasonable divisor exists."""
    hw128 = _round_up(hw, LANE)
    n_lanes = hw128 // LANE
    max_lanes = TARGET_TILE_HW // LANE
    if n_lanes <= max_lanes:
        return hw128, hw128                      # whole image in one HW tile
    best = 1
    for d in range(1, max_lanes + 1):
        if n_lanes % d == 0:
            best = d
    if best >= 32:                               # >= 4096-lane tile, zero padding
        return hw128, best * LANE
    tile = 16384                                 # rare awkward shapes: pad
    return _round_up(hw128, tile), tile


# ---------------------------------------------------------------------------
# Pallas kernel.  grid = (N_instances, HW_tiles); HW (last axis) is the reduction.
# Kernel refs (leading instance/image dim squeezed away by the BlockSpecs):
#   q_ref (4,T)  s_ref (3,T)  z_ref (1,T)  xy_ref (2,T)  m_ref (1,T)
#   xy_out_ref (2,T)  red_ref (16,1)  acc_ref (16,128) scratch
# ---------------------------------------------------------------------------
def _agg_kernel(sids_ref, q_ref, s_ref, z_ref, xy_ref, m_ref,
                xy_out_ref, red_ref, acc_ref):
    del sids_ref                                   # only used by the index_maps
    k = pl.program_id(1)
    nk = pl.num_programs(1)

    @pl.when(k == 0)
    def _init():
        acc_ref[...] = jnp.zeros_like(acc_ref)

    chunks = m_ref.shape[-1] // LANE

    # Register-resident lane-partial accumulation over 128-lane chunks.
    def body(c, carry):
        a_q, a_s, a_z, a_m = carry
        off = pl.multiple_of(c * LANE, LANE)
        sl = pl.ds(off, LANE)
        m = m_ref[:, sl]                                       # (1, 128) 0/1
        xy_out_ref[:, sl] = m * xy_ref[:, sl]                  # masked xy stream-out
        return (a_q + m * q_ref[:, sl],
                a_s + m * s_ref[:, sl],
                a_z + m * z_ref[:, sl],
                a_m + m)

    def _zeros(r):
        return jnp.zeros((r, LANE), jnp.float32)

    a_q, a_s, a_z, a_m = lax.fori_loop(
        0, chunks, body, (_zeros(4), _zeros(3), _zeros(1), _zeros(1)),
        unroll=min(4, chunks))

    # One VMEM read-modify-write per grid step.
    acc_ref[0:9, :] += jnp.concatenate([a_q, a_s, a_z, a_m], axis=0)

    # Epilogue: runs once per instance -> exact math is essentially free.
    @pl.when(k == nk - 1)
    def _finalize():
        sums = jnp.sum(acc_ref[...], axis=-1, keepdims=True)     # (16, 1)
        msize = sums[ROW_MSIZE:ROW_MSIZE + 1, :]                  # sum(mask) (0/1 mask)
        inv = 1.0 / msize                                         # exact reciprocal
        q_mean = sums[ROW_QUAT:ROW_QUAT + 4, :] * inv
        q_norm = jnp.sqrt(jnp.sum(q_mean * q_mean, axis=0, keepdims=True))
        q_unit = q_mean / jnp.maximum(q_norm, 1e-12)              # F.normalize eps
        s_mean = sums[ROW_SCL:ROW_SCL + 3, :] * inv
        z_val = jnp.exp(sums[ROW_Z:ROW_Z + 1, :] * inv)
        red_ref[...] = jnp.concatenate(
            [q_unit, s_mean, z_val, msize,
             jnp.zeros((RED_ROWS - 9, 1), jnp.float32)], axis=0)


def aggregate_instances(sample_ids, masks, quat, scl, z, xy, tile):
    """sample_ids (N,) i32; masks (N,1,HWp) f32; quat (B,4,HWp), scl (B,3,HWp),
    z (B,1,HWp), xy (B,2,HWp) f32.  Returns masked xy (N,2,HWp) f32 and the
    reduced records (N,16,1) f32."""
    n, _, hw_pad = masks.shape
    assert hw_pad % tile == 0 and tile % LANE == 0
    grid = (n, hw_pad // tile)

    def img_map(i, k, sids):                       # gather image by instance id
        return (sids[i], 0, k)

    def inst_map(i, k, sids):
        return (i, 0, k)

    out_shapes = (
        jax.ShapeDtypeStruct((n, 2, hw_pad), jnp.float32),     # masked xy
        jax.ShapeDtypeStruct((n, RED_ROWS, 1), jnp.float32),   # reduced records
    )
    return pl.pallas_call(
        _agg_kernel,
        out_shape=out_shapes,
        grid_spec=pltpu.PrefetchScalarGridSpec(
            num_scalar_prefetch=1,
            grid=grid,
            in_specs=[
                pl.BlockSpec((None, 4, tile), img_map),        # quaternion
                pl.BlockSpec((None, 3, tile), img_map),        # scales
                pl.BlockSpec((None, 1, tile), img_map),        # z
                pl.BlockSpec((None, 2, tile), img_map),        # xy
                pl.BlockSpec((None, 1, tile), inst_map),       # instance mask
            ],
            out_specs=(
                pl.BlockSpec((None, 2, tile), inst_map),
                pl.BlockSpec((None, RED_ROWS, 1), lambda i, k, sids: (i, 0, 0)),
            ),
            scratch_shapes=[pltpu.VMEM((RED_ROWS, LANE), jnp.float32)],
        ),
        compiler_params=pltpu.CompilerParams(
            dimension_semantics=("parallel", "arbitrary"),
        ),
    )(sample_ids, quat, scl, z, xy, masks)


# ---------------------------------------------------------------------------
# Host-side glue: connected-component labeling (scipy, numpy BFS fallback).
# ---------------------------------------------------------------------------
def label_batchwise(class_mask_np):
    mask = class_mask_np > 0
    try:
        from scipy import ndimage
        s = np.zeros((3, 3, 3), dtype=bool)
        s[1] = np.array([[0, 1, 0], [1, 1, 1], [0, 1, 0]], dtype=bool)
        labels, num = ndimage.label(mask, structure=s)
        return labels.astype(np.int32), int(num)
    except ImportError:
        pass
    b, h, w = mask.shape
    labels = np.zeros((b, h, w), dtype=np.int32)
    cur = 0
    for bi in range(b):
        m = mask[bi]
        for r in range(h):
            for c in range(w):
                if m[r, c] and labels[bi, r, c] == 0:
                    cur += 1
                    stack = [(r, c)]
                    labels[bi, r, c] = cur
                    while stack:
                        rr, cc = stack.pop()
                        for dr, dc in ((1, 0), (-1, 0), (0, 1), (0, -1)):
                            nr, nc = rr + dr, cc + dc
                            if (0 <= nr < h and 0 <= nc < w and m[nr, nc]
                                    and labels[bi, nr, nc] == 0):
                                labels[bi, nr, nc] = cur
                                stack.append((nr, nc))
    return labels, cur


def _prep_image_channels(arr, hw_pad):
    arr = jnp.asarray(arr, dtype=jnp.float32)
    if arr.ndim == 3:                                  # z: (B, H, W) -> (B, 1, HW)
        flat = arr.reshape(arr.shape[0], 1, -1)
    else:                                              # (B, C, H, W) -> (B, C, HW)
        flat = arr.reshape(arr.shape[0], arr.shape[1], -1)
    hw = flat.shape[-1]
    if hw_pad != hw:
        flat = jnp.pad(flat, ((0, 0), (0, 0), (0, hw_pad - hw)))
    return flat


# ---------------------------------------------------------------------------
# AggregationLayer.forward equivalent (single pallas_call per forward)
# ---------------------------------------------------------------------------
def aggregation_forward(cat_mask, data, classes):
    cat_np = np.asarray(cat_mask)
    b, h, w = cat_np.shape
    hw = h * w

    # Host glue: per-class instance masks + sample ids (same as reference).
    per_class = []
    for class_id in range(1, classes):
        class_mask = (cat_np == class_id).astype(np.float32)
        labels, total = label_batchwise(class_mask)
        sample_ids = np.zeros((total,), dtype=np.int32)
        pure_masks = np.zeros((total, h, w), dtype=np.float32)
        for i in range(1, total + 1):
            element_id = int(np.argwhere(labels == i)[0][0])
            pure_masks[i - 1] = (labels[element_id] == i).astype(np.float32)
            sample_ids[i - 1] = element_id
        per_class.append((class_id, sample_ids, pure_masks))

    total_all = int(sum(p[1].shape[0] for p in per_class))
    if total_all == 0:
        return [{'total_num_of_instances': 0,
                 'sample_ids': jnp.zeros((0,), jnp.int32),
                 'instance_masks': jnp.zeros((0, h, w), jnp.float32),
                 'quaternion': jnp.zeros((0, 4), jnp.float32),
                 'scales': jnp.zeros((0, 3), jnp.float32),
                 'z': jnp.zeros((0, 1), jnp.float32),
                 'xy': jnp.zeros((0, 2, h, w), jnp.float32)} for _ in per_class]

    hw_pad, tile = _choose_tiling(hw)

    all_sids = np.concatenate([p[1] for p in per_class], axis=0).astype(np.int32)
    all_masks = np.concatenate([p[2] for p in per_class],
                               axis=0).reshape(total_all, 1, hw)
    if hw_pad != hw:
        all_masks = np.pad(all_masks, ((0, 0), (0, 0), (0, hw_pad - hw)))

    sids_dev = jnp.asarray(all_sids)
    masks_dev = jnp.asarray(all_masks, dtype=jnp.float32)
    quat = _prep_image_channels(data['quaternion'], hw_pad)
    scl = _prep_image_channels(data['scales'], hw_pad)
    z = _prep_image_channels(data['z'], hw_pad)
    xy = _prep_image_channels(data['xy'], hw_pad)

    xy_masked, red = aggregate_instances(sids_dev, masks_dev, quat, scl, z, xy, tile)

    # Split the batched results back per class.
    agg_pred = []
    offset = 0
    for class_id, sids_np, masks_np in per_class:
        nc = int(sids_np.shape[0])
        sl = slice(offset, offset + nc)
        class_data = {
            'total_num_of_instances': nc,
            'sample_ids': jnp.asarray(sids_np),
            'instance_masks': jnp.asarray(masks_np),
            'quaternion': red[sl, ROW_QUAT:ROW_QUAT + 4, 0],
            'scales': red[sl, ROW_SCL:ROW_SCL + 3, 0],
            'z': red[sl, ROW_Z:ROW_Z + 1, 0],
            'xy': xy_masked[sl, :, :hw].reshape(nc, 2, h, w),
        }
        offset += nc
        agg_pred.append(class_data)
    return agg_pred


# ---------------------------------------------------------------------------
# Pure-numpy reference for a sanity check
# ---------------------------------------------------------------------------
def _ref_aggregate(mask, quat, scl, z, xy):
    msize = mask.sum(axis=(-2, -1))                       # (N,)
    q = (mask[:, None] * quat).sum(axis=(-2, -1)) / msize[:, None]
    q = q / np.maximum(np.linalg.norm(q, axis=1, keepdims=True), 1e-12)
    s = (mask[:, None] * scl).sum(axis=(-2, -1)) / msize[:, None]
    zz = np.exp((mask[:, None] * z[:, None]).sum(axis=(-2, -1)) / msize[:, None])
    xym = mask[:, None] * xy
    return q, s, zz, xym


if __name__ == "__main__":
    B, H, W = 2, 16, 16
    CLASSES = 3

    key = jax.random.PRNGKey(0)
    k_mask, k_q, k_s, k_xy, k_z = jax.random.split(key, 5)

    cat_mask = jax.random.randint(k_mask, (B, H, W), 0, CLASSES, dtype=jnp.int32)
    data = {
        'quaternion': jax.random.normal(k_q, (B, 4, H, W), jnp.float32),
        'scales':     jax.random.normal(k_s, (B, 3, H, W), jnp.float32),
        'xy':         jax.random.normal(k_xy, (B, 2, H, W), jnp.float32),
        'z':          0.1 * jax.random.normal(k_z, (B, H, W), jnp.float32),
    }

    agg_pred = aggregation_forward(cat_mask, data, CLASSES)
    jax.block_until_ready([c['quaternion'] for c in agg_pred]
                          + [c['xy'] for c in agg_pred])

    # sanity check against the numpy reference
    for class_data in agg_pred:
        n = class_data['total_num_of_instances']
        if n == 0:
            continue
        sids = np.asarray(class_data['sample_ids'])
        masks = np.asarray(class_data['instance_masks'])
        q_ref, s_ref, z_ref, xy_ref = _ref_aggregate(
            masks,
            np.asarray(data['quaternion'])[sids],
            np.asarray(data['scales'])[sids],
            np.asarray(data['z'])[sids],
            np.asarray(data['xy'])[sids],
        )
        np.testing.assert_allclose(np.asarray(class_data['quaternion']), q_ref,
                                   rtol=1e-4, atol=1e-4)
        np.testing.assert_allclose(np.asarray(class_data['scales']), s_ref,
                                   rtol=1e-4, atol=1e-4)
        np.testing.assert_allclose(np.asarray(class_data['z']), z_ref,
                                   rtol=1e-4, atol=1e-4)
        np.testing.assert_allclose(np.asarray(class_data['xy']), xy_ref,
                                   rtol=1e-4, atol=1e-4)

    print("KERNEL_OK")
</pallas_src>

<mosaic_0001>
module attributes {stable_mosaic.version = 11 : i64} {
  func.func @_agg_kernel(%arg0: i32, %arg1: i32, %arg2: memref<146xi32, #tpu.memory_space<smem>>, %arg3: memref<1x4x256xf32, #tpu.memory_space<vmem>>, %arg4: memref<1x3x256xf32, #tpu.memory_space<vmem>>, %arg5: memref<1x1x256xf32, #tpu.memory_space<vmem>>, %arg6: memref<1x2x256xf32, #tpu.memory_space<vmem>>, %arg7: memref<1x1x256xf32, #tpu.memory_space<vmem>>, %arg8: memref<1x2x256xf32, #tpu.memory_space<vmem>>, %arg9: memref<1x16x1xf32, #tpu.memory_space<vmem>>, %arg10: memref<16x128xf32, #tpu.memory_space<vmem>>) attributes {dimension_semantics = [#tpu.dimension_semantics<parallel>, #tpu.dimension_semantics<arbitrary>], iteration_bounds = array<i64: 146, 1>, scalar_prefetch = 1 : i64, scratch_operands = 1 : i64, tpu.core_type = #tpu.core_type<tc>, window_params = [{transform_indices = @transform_0, window_bounds = array<i64: 1, 4, 256>}, {transform_indices = @transform_1, window_bounds = array<i64: 1, 3, 256>}, {transform_indices = @transform_2, window_bounds = array<i64: 1, 1, 256>}, {transform_indices = @transform_3, window_bounds = array<i64: 1, 2, 256>}, {transform_indices = @transform_4, window_bounds = array<i64: 1, 1, 256>}, {transform_indices = @transform_5, window_bounds = array<i64: 1, 2, 256>}, {transform_indices = @transform_6, window_bounds = array<i64: 1, 16, 1>}]} {
    %c0_i32 = arith.constant 0 : i32
    %0 = arith.cmpi eq, %arg1, %c0_i32 : i32
    %1 = arith.extui %0 : i1 to i32
    %c0_i32_0 = arith.constant 0 : i32
    %2 = arith.cmpi ne, %1, %c0_i32_0 : i32
    scf.if %2 {
      %cst_35 = arith.constant 0.000000e+00 : f32
      %78 = vector.broadcast %cst_35 : f32 to vector<16x128xf32>
      %c0_36 = arith.constant 0 : index
      %c0_37 = arith.constant 0 : index
      %79 = vector.load %arg10[%c0_36, %c0_37] : memref<16x128xf32, #tpu.memory_space<vmem>>, vector<16x128xf32>
      tpu.vector_store %arg10[%c0_36, %c0_37], %78 {strides = array<i32>} : memref<16x128xf32, #tpu.memory_space<vmem>>, vector<16x128xf32>,
    } else {
    }
    %cst = arith.constant 0.000000e+00 : f32
    %3 = vector.broadcast %cst : f32 to vector<4x128xf32>
    %cst_1 = arith.constant 0.000000e+00 : f32
    %4 = vector.broadcast %cst_1 : f32 to vector<3x128xf32>
    %cst_2 = arith.constant 0.000000e+00 : f32
    %5 = vector.broadcast %cst_2 : f32 to vector<1x128xf32>
    %cst_3 = arith.constant 0.000000e+00 : f32
    %6 = vector.broadcast %cst_3 : f32 to vector<1x128xf32>
    %c0_i32_4 = arith.constant 0 : i32
    %c128_i32 = arith.constant 128 : i32
    %7 = arith.muli %c0_i32_4, %c128_i32 : i32
    %8 = tpu.assume_multiple %7, 128 : i32
    %c0 = arith.constant 0 : index
    %c0_5 = arith.constant 0 : index
    %9 = arith.index_cast %8 : i32 to index
    %10 = vector.load %arg7[%c0, %c0_5, %9] : memref<1x1x256xf32, #tpu.memory_space<vmem>>, vector<1x1x128xf32>
    %11 = vector.shape_cast %10 : vector<1x1x128xf32> to vector<1x128xf32>
    %c0_6 = arith.constant 0 : index
    %c0_7 = arith.constant 0 : index
    %12 = arith.index_cast %8 : i32 to index
    %13 = vector.load %arg6[%c0_6, %c0_7, %12] : memref<1x2x256xf32, #tpu.memory_space<vmem>>, vector<1x2x128xf32>
    %14 = vector.shape_cast %13 : vector<1x2x128xf32> to vector<2x128xf32>
    %15 = vector.broadcast %11 : vector<1x128xf32> to vector<2x128xf32>
    %16 = arith.mulf %15, %14 : vector<2x128xf32>
    %c0_8 = arith.constant 0 : index
    %c0_9 = arith.constant 0 : index
    %17 = arith.index_cast %8 : i32 to index
    %18 = vector.load %arg8[%c0_8, %c0_9, %17] : memref<1x2x256xf32, #tpu.memory_space<vmem>>, vector<1x2x128xf32>
    %19 = vector.shape_cast %18 : vector<1x2x128xf32> to vector<2x128xf32>
    %20 = vector.shape_cast %16 : vector<2x128xf32> to vector<1x2x128xf32>
    tpu.vector_store %arg8[%c0_8, %c0_9, %17], %20 {strides = array<i32>} : memref<1x2x256xf32, #tpu.memory_space<vmem>>, vector<1x2x128xf32>,
    %c0_10 = arith.constant 0 : index
    %c0_11 = arith.constant 0 : index
    %21 = arith.index_cast %8 : i32 to index
    %22 = vector.load %arg3[%c0_10, %c0_11, %21] : memref<1x4x256xf32, #tpu.memory_space<vmem>>, vector<1x4x128xf32>
    %23 = vector.shape_cast %22 : vector<1x4x128xf32> to vector<4x128xf32>
    %24 = vector.broadcast %11 : vector<1x128xf32> to vector<4x128xf32>
    %25 = arith.mulf %24, %23 : vector<4x128xf32>
    %26 = arith.addf %3, %25 : vector<4x128xf32>
    %c0_12 = arith.constant 0 : index
    %c0_13 = arith.constant 0 : index
    %27 = arith.index_cast %8 : i32 to index
    %28 = vector.load %arg4[%c0_12, %c0_13, %27] : memref<1x3x256xf32, #tpu.memory_space<vmem>>, vector<1x3x128xf32>
    %29 = vector.shape_cast %28 : vector<1x3x128xf32> to vector<3x128xf32>
    %30 = vector.broadcast %11 : vector<1x128xf32> to vector<3x128xf32>
    %31 = arith.mulf %30, %29 : vector<3x128xf32>
    %32 = arith.addf %4, %31 : vector<3x128xf32>
    %c0_14 = arith.constant 0 : index
    %c0_15 = arith.constant 0 : index
    %33 = arith.index_cast %8 : i32 to index
    %34 = vector.load %arg5[%c0_14, %c0_15, %33] : memref<1x1x256xf32, #tpu.memory_space<vmem>>, vector<1x1x128xf32>
    %35 = vector.shape_cast %34 : vector<1x1x128xf32> to vector<1x128xf32>
    %36 = arith.mulf %11, %35 : vector<1x128xf32>
    %37 = arith.addf %5, %36 : vector<1x128xf32>
    %38 = arith.addf %6, %11 : vector<1x128xf32>
    %c1_i32 = arith.constant 1 : i32
    %c128_i32_16 = arith.constant 128 : i32
    %39 = arith.muli %c1_i32, %c128_i32_16 : i32
    %40 = tpu.assume_multiple %39, 128 : i32
    %c0_17 = arith.constant 0 : index
    %c0_18 = arith.constant 0 : index
    %41 = arith.index_cast %40 : i32 to index
    %42 = vector.load %arg7[%c0_17, %c0_18, %41] : memref<1x1x256xf32, #tpu.memory_space<vmem>>, vector<1x1x128xf32>
    %43 = vector.shape_cast %42 : vector<1x1x128xf32> to vector<1x128xf32>
    %c0_19 = arith.constant 0 : index
    %c0_20 = arith.constant 0 : index
    %44 = arith.index_cast %40 : i32 to index
    %45 = vector.load %arg6[%c0_19, %c0_20, %44] : memref<1x2x256xf32, #tpu.memory_space<vmem>>, vector<1x2x128xf32>
    %46 = vector.shape_cast %45 : vector<1x2x128xf32> to vector<2x128xf32>
    %47 = vector.broadcast %43 : vector<1x128xf32> to vector<2x128xf32>
    %48 = arith.mulf %47, %46 : vector<2x128xf32>
    %c0_21 = arith.constant 0 : index
    %c0_22 = arith.constant 0 : index
    %49 = arith.index_cast %40 : i32 to index
    %50 = vector.load %arg8[%c0_21, %c0_22, %49] : memref<1x2x256xf32, #tpu.memory_space<vmem>>, vector<1x2x128xf32>
    %51 = vector.shape_cast %50 : vector<1x2x128xf32> to vector<2x128xf32>
    %52 = vector.shape_cast %48 : vector<2x128xf32> to vector<1x2x128xf32>
    tpu.vector_store %arg8[%c0_21, %c0_22, %49], %52 {strides = array<i32>} : memref<1x2x256xf32, #tpu.memory_space<vmem>>, vector<1x2x128xf32>,
    %c0_23 = arith.constant 0 : index
    %c0_24 = arith.constant 0 : index
    %53 = arith.index_cast %40 : i32 to index
    %54 = vector.load %arg3[%c0_23, %c0_24, %53] : memref<1x4x256xf32, #tpu.memory_space<vmem>>, vector<1x4x128xf32>
    %55 = vector.shape_cast %54 : vector<1x4x128xf32> to vector<4x128xf32>
    %56 = vector.broadcast %43 : vector<1x128xf32> to vector<4x128xf32>
    %57 = arith.mulf %56, %55 : vector<4x128xf32>
    %58 = arith.addf %26, %57 : vector<4x128xf32>
    %c0_25 = arith.constant 0 : index
    %c0_26 = arith.constant 0 : index
    %59 = arith.index_cast %40 : i32 to index
    %60 = vector.load %arg4[%c0_25, %c0_26, %59] : memref<1x3x256xf32, #tpu.memory_space<vmem>>, vector<1x3x128xf32>
    %61 = vector.shape_cast %60 : vector<1x3x128xf32> to vector<3x128xf32>
    %62 = vector.broadcast %43 : vector<1x128xf32> to vector<3x128xf32>
    %63 = arith.mulf %62, %61 : vector<3x128xf32>
    %64 = arith.addf %32, %63 : vector<3x128xf32>
    %c0_27 = arith.constant 0 : index
    %c0_28 = arith.constant 0 : index
    %65 = arith.index_cast %40 : i32 to index
    %66 = vector.load %arg5[%c0_27, %c0_28, %65] : memref<1x1x256xf32, #tpu.memory_space<vmem>>, vector<1x1x128xf32>
    %67 = vector.shape_cast %66 : vector<1x1x128xf32> to vector<1x128xf32>
    %68 = arith.mulf %43, %67 : vector<1x128xf32>
    %69 = arith.addf %37, %68 : vector<1x128xf32>
    %70 = arith.addf %38, %43 : vector<1x128xf32>
    %c2_i32 = arith.constant 2 : i32
    %c0_29 = arith.constant 0 : index
    %c0_30 = arith.constant 0 : index
    %71 = vector.load %arg10[%c0_29, %c0_30] : memref<16x128xf32, #tpu.memory_space<vmem>>, vector<9x128xf32>
    %72 = tpu.concatenate %58, %64, %69, %70 in 0 : vector<4x128xf32>, vector<3x128xf32>, vector<1x128xf32>, vector<1x128xf32> -> vector<9x128xf32>
    %73 = arith.addf %71, %72 : vector<9x128xf32>
    %c0_31 = arith.constant 0 : index
    %c0_32 = arith.constant 0 : index
    %74 = vector.load %arg10[%c0_31, %c0_32] : memref<16x128xf32, #tpu.memory_space<vmem>>, vector<9x128xf32>
    tpu.vector_store %arg10[%c0_31, %c0_32], %73 {strides = array<i32>} : memref<16x128xf32, #tpu.memory_space<vmem>>, vector<9x128xf32>,
    %c0_i32_33 = arith.constant 0 : i32
    %75 = arith.cmpi eq, %arg1, %c0_i32_33 : i32
    %76 = arith.extui %75 : i1 to i32
    %c0_i32_34 = arith.constant 0 : i32
    %77 = arith.cmpi ne, %76, %c0_i32_34 : i32
    scf.if %77 {
      %c0_35 = arith.constant 0 : index
      %c0_36 = arith.constant 0 : index
      %78 = vector.load %arg10[%c0_35, %c0_36] : memref<16x128xf32, #tpu.memory_space<vmem>>, vector<16x128xf32>
      %cst_37 = arith.constant dense<0.000000e+00> : vector<16xf32>
      %79 = vector.multi_reduction <add>, %78, %cst_37 [1] : vector<16x128xf32> to vector<16xf32>
      %80 = vector.shape_cast %79 : vector<16xf32> to vector<16x1xf32>
      %81 = vector.extract_strided_slice %80 {offsets = [8, 0], sizes = [1, 1], strides = [1, 1]} : vector<16x1xf32> to vector<1x1xf32>
      %cst_38 = arith.constant 1.000000e+00 : f32
      %82 = vector.broadcast %cst_38 : f32 to vector<1x1xf32>
      %83 = arith.divf %82, %81 : vector<1x1xf32>
      %84 = vector.extract_strided_slice %80 {offsets = [0, 0], sizes = [4, 1], strides = [1, 1]} : vector<16x1xf32> to vector<4x1xf32>
      %85 = vector.broadcast %83 : vector<1x1xf32> to vector<4x1xf32>
      %86 = arith.mulf %84, %85 : vector<4x1xf32>
      %87 = arith.mulf %86, %86 : vector<4x1xf32>
      %cst_39 = arith.constant dense<0.000000e+00> : vector<1xf32>
      %88 = vector.multi_reduction <add>, %87, %cst_39 [0] : vector<4x1xf32> to vector<1xf32>
      %89 = vector.shape_cast %88 : vector<1xf32> to vector<1x1xf32>
      %90 = math.sqrt %89 : vector<1x1xf32>
      %cst_40 = arith.constant 9.99999996E-13 : f32
      %91 = vector.broadcast %cst_40 : f32 to vector<1x1xf32>
      %92 = arith.maximumf %90, %91 : vector<1x1xf32>
      %93 = vector.broadcast %92 : vector<1x1xf32> to vector<4x1xf32>
      %94 = arith.divf %86, %93 : vector<4x1xf32>
      %95 = vector.extract_strided_slice %80 {offsets = [4, 0], sizes = [3, 1], strides = [1, 1]} : vector<16x1xf32> to vector<3x1xf32>
      %96 = vector.broadcast %83 : vector<1x1xf32> to vector<3x1xf32>
      %97 = arith.mulf %95, %96 : vector<3x1xf32>
      %98 = vector.extract_strided_slice %80 {offsets = [7, 0], sizes = [1, 1], strides = [1, 1]} : vector<16x1xf32> to vector<1x1xf32>
      %99 = arith.mulf %98, %83 : vector<1x1xf32>
      %100 = math.exp %99 : vector<1x1xf32>
      %cst_41 = arith.constant 0.000000e+00 : f32
      %101 = vector.broadcast %cst_41 : f32 to vector<7x1xf32>
      %102 = tpu.concatenate %94, %97, %100, %81, %101 in 0 : vector<4x1xf32>, vector<3x1xf32>, vector<1x1xf32>, vector<1x1xf32>, vector<7x1xf32> -> vector<16x1xf32>
      %c0_42 = arith.constant 0 : index
      %c0_43 = arith.constant 0 : index
      %c0_44 = arith.constant 0 : index
      %103 = vector.load %arg9[%c0_42, %c0_43, %c0_44] : memref<1x16x1xf32, #tpu.memory_space<vmem>>, vector<1x16x1xf32>
      %104 = vector.shape_cast %103 : vector<1x16x1xf32> to vector<16x1xf32>
      %105 = vector.shape_cast %102 : vector<16x1xf32> to vector<1x16x1xf32>
      tpu.vector_store %arg9[%c0_42, %c0_43, %c0_44], %105 {strides = array<i32>} : memref<1x16x1xf32, #tpu.memory_space<vmem>>, vector<1x16x1xf32>,
    } else {
    }
    return
  }
  func.func @transform_0(%arg0: i32, %arg1: i32, %arg2: memref<146xi32, #tpu.memory_space<smem>>) -> (i32, i32, i32) {
    %0 = arith.index_cast %arg0 : i32 to index
    %1 = memref.load %arg2[%0] : memref<146xi32, #tpu.memory_space<smem>>
    %c0_i32 = arith.constant 0 : i32
    %c0_i32_0 = arith.constant 0 : i32
    return %1, %c0_i32, %arg1 : i32, i32, i32
  }
  func.func @transform_1(%arg0: i32, %arg1: i32, %arg2: memref<146xi32, #tpu.memory_space<smem>>) -> (i32, i32, i32) {
    %0 = arith.index_cast %arg0 : i32 to index
    %1 = memref.load %arg2[%0] : memref<146xi32, #tpu.memory_space<smem>>
    %c0_i32 = arith.constant 0 : i32
    %c0_i32_0 = arith.constant 0 : i32
    return %1, %c0_i32, %arg1 : i32, i32, i32
  }
  func.func @transform_2(%arg0: i32, %arg1: i32, %arg2: memref<146xi32, #tpu.memory_space<smem>>) -> (i32, i32, i32) {
    %0 = arith.index_cast %arg0 : i32 to index
    %1 = memref.load %arg2[%0] : memref<146xi32, #tpu.memory_space<smem>>
    %c0_i32 = arith.constant 0 : i32
    %c0_i32_0 = arith.constant 0 : i32
    return %1, %c0_i32, %arg1 : i32, i32, i32
  }
  func.func @transform_3(%arg0: i32, %arg1: i32, %arg2: memref<146xi32, #tpu.memory_space<smem>>) -> (i32, i32, i32) {
    %0 = arith.index_cast %arg0 : i32 to index
    %1 = memref.load %arg2[%0] : memref<146xi32, #tpu.memory_space<smem>>
    %c0_i32 = arith.constant 0 : i32
    %c0_i32_0 = arith.constant 0 : i32
    return %1, %c0_i32, %arg1 : i32, i32, i32
  }
  func.func @transform_4(%arg0: i32, %arg1: i32, %arg2: memref<146xi32, #tpu.memory_space<smem>>) -> (i32, i32, i32) {
    %c0_i32 = arith.constant 0 : i32
    %c0_i32_0 = arith.constant 0 : i32
    return %arg0, %c0_i32, %arg1 : i32, i32, i32
  }
  func.func @transform_5(%arg0: i32, %arg1: i32, %arg2: memref<146xi32, #tpu.memory_space<smem>>) -> (i32, i32, i32) {
    %c0_i32 = arith.constant 0 : i32
    %c0_i32_0 = arith.constant 0 : i32
    return %arg0, %c0_i32, %arg1 : i32, i32, i32
  }
  func.func @transform_6(%arg0: i32, %arg1: i32, %arg2: memref<146xi32, #tpu.memory_space<smem>>) -> (i32, i32, i32) {
    %c0_i32 = arith.constant 0 : i32
    %c0_i32_0 = arith.constant 0 : i32
    %c0_i32_1 = arith.constant 0 : i32
    return %arg0, %c0_i32, %c0_i32_0 : i32, i32, i32
  }
}

</mosaic_0001>

<bundles_post_ra>
// kernel: tpu_custom_call.1
= control target key start
LH: loop header
LB: loop body
LE: loop exit
PB: predicated region body
PF: predicated region fallthrough
CT: control target
= control target key end

     0   :  { %s1335_s24 = smov [#allocation4]   ;;  %s1870_s0 = inlined_call_operand.hbm [shape: s32[146], index: 0, kind: input, shape index: {}]   ;;  %s1871_s1 = inlined_call_operand.hbm [shape: f32[2,4,256], index: 1, kind: input, shape index: {}]   ;;  %s1872_s2 = inlined_call_operand.vmem [shape: f32[2,3,256], index: 2, kind: input, shape index: {}]   ;;  %s1873_s3 = inlined_call_operand.hbm [shape: f32[2,1,256], index: 3, kind: input, shape index: {}]   ;;  %s1874_s4 = inlined_call_operand.hbm [shape: f32[2,2,256], index: 4, kind: input, shape index: {}]   ;;  %s1875_s5 = inlined_call_operand.hbm [shape: f32[146,1,256], index: 5, kind: input, shape index: {}]   ;;  %s1876_s6 = inlined_call_operand.hbm [shape: f32[146,2,256], index: 6, kind: output, shape index: {0}]   ;;  %s1877_s7 = inlined_call_operand.vmem [shape: f32[146,16,1], index: 7, kind: output, shape index: {1}]  }
   0x1   :  { %1895 = sst [smem:[#allocation34_spill]] %s1871_s1 }
   0x2   :  { %1896 = sst [smem:[#allocation35_spill]] %s1872_s2 }
   0x3   :  { %1897 = sst [smem:[#allocation36_spill]] %s1873_s3 }
   0x4   :  { %1898 = sst [smem:[#allocation37_spill]] %s1874_s4 }
   0x5   :  { %1899 = sst [smem:[#allocation38_spill]] %s1875_s5 }
   0x6   :  { %1900 = sst [smem:[#allocation39_spill]] %s1876_s6 }
   0x7   :  { %1901 = sst [smem:[#allocation40_spill]] %s1877_s7 }
   0x8   :  { %14 = dma.hbm_to_smem %s1870_s0, 32, %s1335_s24, [#allocation3] }
   0x9   :  { %1253 = dma.done.wait [#allocation3], 32 }
   0xa   :  { %1254 = vsyncadd [#allocation3], 4294967264 }
   0xb   :  { %16 = sfence }
   0xc   :  { %17 = vsyncpa [#allocation6], 0 }
   0xd   :  { %19 = vsyncpa [#allocation6 + $0x1], 0 }
   0xe   :  { %20 = vsyncpa [#allocation9], 0 }
   0xf   :  { %22 = vsyncpa [#allocation9 + $0x1], 0 }
  0x10   :  { %23 = vsyncpa [#allocation12], 0 }
  0x11   :  { %25 = vsyncpa [#allocation12 + $0x1], 0 }
  0x12   :  { %26 = vsyncpa [#allocation7], 0 }
  0x13   :  { %28 = vsyncpa [#allocation7 + $0x1], 0  ;;  %s1385_s27 = smov 0   ;;  %s1387_s28 = smov 0  }
  0x14   :  { %s1389_s29 = smov 0   ;;  %s1391_s30 = smov 0  }
  0x15   :  { %s1393_s0 = smov 0   ;;  %s1395_s8 = smov 0  }
  0x16   :  { %s1397_s9 = smov 0   ;;  %s1399_s10 = smov 0  }
  0x17   :  { %s1401_s11 = smov 0   ;;  %s1403_s12 = smov 0  }
  0x18   :  { %s1405_s13 = smov 0   ;;  %s1407_s14 = smov 0  }
  0x19   :  { %s1409_s15 = smov 0   ;;  %s1411_s16 = smov 0  }
  0x1a   :  { %s1413_s17 = smov 0  }
  0x1b LB: > { %1902 = sst [smem:[#allocation26_spill]] %s1277_s27  ;;  %s1459_s18 = sadd.s32 4294967295, %s1333_s17   ;;  %s1333_s17 = sphi %s1413_s17, %s34_s17   ;;  %s1329_s16 = sphi %s1411_s16, %s1983_s16   ;;  %s1325_s15 = sphi %s1409_s15, %s1982_s15   ;;  %s1321_s14 = sphi %s1407_s14, %s1981_s14   ;;  %s1317_s13 = sphi %s1405_s13, %s1980_s13   ;;  %s1313_s12 = sphi %s1403_s12, %s1979_s12   ;;  %s1309_s11 = sphi %s1401_s11, %s1968_s11   ;;  %s1305_s10 = sphi %s1399_s10, %s1978_s10   ;;  %s1301_s9 = sphi %s1397_s9, %s1977_s9   ;;  %s1297_s8 = sphi %s1395_s8, %s1976_s8   ;;  %s1293_s0 = sphi %s1393_s0, %s1975_s0   ;;  %s1289_s30 = sphi %s1391_s30, %s1974_s30   ;;  %s1285_s29 = sphi %s1389_s29, %s1973_s29   ;;  %s1281_s28 = sphi %s1387_s28, %s1972_s28   ;;  %s1277_s27 = sphi %s1385_s27, %s1971_s27  }
  0x1c   : > { %1903 = sst [smem:[#allocation27_spill]] %s1305_s10  ;;  %s46_s19 = sadd.s32 1, %s1329_s16 }
  0x1d   : > { %1904 = sst [smem:[#allocation28_spill]] %s1309_s11  ;;  %p48_p0 = scmp.ge.s32.totalorder %s46_s19, 146 }
  0x1e   : > { %1905 = sst [smem:[#allocation29_spill]] %s1325_s15  ;;  %p1889_p1 = scmp.eq.s32.totalorder %s1333_s17, 0 }
  0x1f   : > { %p1888_p2 = scmp.eq.s32.totalorder %s1459_s18, 0  ;;  %s110_s20 = sld [smem:[#allocation4 + %s1329_s16]] }
  0x20   : > { %s1985_s19 = smov (%p48_p0, %s46_s19), 0  ;;  %s117_s21 = sadd.s32 1, %s1309_s11 }
  0x21   : > { %p124_p3 = scmp.ne.s32.totalorder %s1309_s11, %s1305_s10  ;;  %s111_s22 = sld [smem:[#allocation4 + %s1985_s19]] }
  0x22   : > { %p130_p4 = scmp.ne.s32.totalorder %s1305_s10, %s1301_s9  ;;  %p1887_p7 = scmp.lt.s32.totalorder %s1333_s17, 146 }
  0x23   : > { %p1474_p5 = por %p124_p3, %p1889_p1  ;;  %s303_s25 = sand.u32 1, %s1333_s17  }
  0x24   : > { %p1480_p6 = por %p130_p4, %p1888_p2  ;;  %s305_s26 = sand.u32 1, %s1309_s11  }
  0x25   : > { %s839_s9 = sshll.u32 %s305_s26, 1  ;;  %p1491_p8 = pnand %p1887_p7, %p1474_p5 }
  0x26   : > { %s1907_s24 = scalar_select %p1480_p6, 1, 0 }
  0x27   : > { %s112_s6 = ssub.s32 %s110_s20, %s111_s22  ;;  %s307_s2 = scalar_lea.vmem [#allocation8], %s839_s9 }
  0x28   : > { %1908 = sst [smem:[#allocation30_spill]] %s1907_s24  ;;  %s318_s15 = sshll.u32 %s307_s2, 4  ;;  %s1495_s15 = int_to_ptr.vmem [resolvable:$true] %s318_s15 }
  0x29   : > { %p115_p9 = scmp.eq.s32.totalorder %s112_s6, 0  ;;  %p848_p10 = scmp.ge.s32.totalorder %s1333_s17, 1 }
  0x2a   : > { %s879_s24 = scalar_select %p1474_p5, [#allocation4], [#allocation15] }
  0x2b   : > { %s1500_s10 = scalar_select %p115_p9, %s1309_s11, %s117_s21  }
  0x2c   : > { %s880_s26 = scalar_select %p1474_p5, %s1329_s16, 0 }
  0x2d   : > { %1910 = sst [smem:[#allocation31_spill]] %s1500_s10  ;;  %s1987_s24 = smov (!%p1887_p7, %s879_s24), [#allocation18] }
  0x2e   : > { %s1989_s26 = smov (!%p1887_p7, %s880_s26), 0  ;;  %p366_p11 = scmp.lt.s32.totalorder %s1333_s17, 147 }
  0x2f   : > { %s308_s20 = sld [smem:[%s1987_s24 + %s1989_s26]]  ;;  %s57_s11 = sadd.s32 1, %s1321_s14 }
  0x30   : > { %p1511_p12 = pnand %p848_p10, %p366_p11  ;;  %s1516_s6 = sld [smem:[#allocation4 + %s1329_s16]] }
  0x31   : > { %s1519_s9 = sld [smem:[#allocation4 + %s1985_s19]]  ;;  %s1525_s5 = scalar_lea.sflag [#allocation9], %s303_s25 }
  0x32   : > { %s1911_s2 = scalar_select %p1511_p12, 1, 0 }
  0x33   : > { %s1913_s3 = sld [smem:[#allocation36_spill]]  ;;  %p1057_p0 = pneg %p1491_p8 }
  0x34   : > { %1912 = sst [smem:[#allocation32_spill]] %s1911_s2 }
  0x35   : > { %s870_s22 = sshll.u32 %s308_s20, 5 }
  0x39   : > { %s316_s10 = scalar_lea.hbm %s1913_s3, %s870_s22  ;;  %s1060_s2 = scalar_lea.hbm %s1913_s3, 64 }
  0x3a   : > { %s1055_s4 = scalar_lea.hbm %s316_s10, 32  ;;  %p1061_p5 = scmp.lt.s32.totalorder %s316_s10, %s1913_s3 }
  0x3b   : > { %p1056_p13 = scmp.ne.s32.totalorder %s316_s10, %s1055_s4  ;;  %p1062_p9 = scmp.lt.s32.totalorder %s1060_s2, %s1055_s4 }
  0x3d   : > { %p1058_p3 = pnand %p1057_p0, %p1056_p13  ;;  %p1063_p10 = por %p1062_p9, %p1061_p5 }
  0x3f   : > { %p1059_p4 = pneg %p1058_p3 }
  0x41   : > { %p1064_p11 = pnand %p1063_p10, %p1059_p4 }
  0x43   : > { %1067 = shalt.err (!%p1064_p11)
}
  0x44   : > { %s1068_s25 = scalar_lea.vmem %s1495_s15, 32  ;;  %s1336_s22 = smov [#allocation8]  }
  0x45   : > { %p1069_p7 = scmp.ne.s32.totalorder %s1495_s15, %s1068_s25  ;;  %s1073_s21 = sshll.u32 %s1336_s22, 4  ;;  %s1074_s21 = int_to_ptr.vmem [resolvable:$false] %s1073_s21 }
  0x46   : > { %s1075_s23 = scalar_lea.vmem %s1074_s21, 64  ;;  %p1076_p3 = scmp.lt.s32.totalorder %s1495_s15, %s1074_s21 }
  0x47   : > { %p1071_p2 = pnand %p1069_p7, %p1057_p0  ;;  %p1077_p1 = scmp.lt.s32.totalorder %s1075_s23, %s1068_s25 }
  0x49   : > { %p1072_p13 = pneg %p1071_p2  ;;  %p1078_p6 = por %p1077_p1, %p1076_p3 }
  0x4b   : > { %p1079_p12 = pnand %p1078_p6, %p1072_p13 }
  0x4d   : > { %1082 = shalt.err (!%p1079_p12)
}
  0x4e   : > { %902 = dma.hbm_to_vmem [thread:$0]  (!%p1491_p8), %s316_s10, 32, %s1495_s15, %s1525_s5  }
  0x4f   : > { %p64_p1 = scmp.ne.s32.totalorder %s1321_s14, %s1317_s13  ;;  %p70_p2 = scmp.ne.s32.totalorder %s1317_s13, %s1313_s12 }
  0x50   : > { %s266_s4 = sand.u32 1, %s1321_s14   ;;  %p1914_p6 = scmp.eq.s32.totalorder %s1333_s17, 0 }
  0x51   : > { %p1915_p12 = scmp.eq.s32.totalorder %s1459_s18, 0  ;;  %s52_s27 = ssub.s32 %s1516_s6, %s1519_s9 }
  0x52   : > { %p66_p7 = por %p1914_p6, %p64_p1  ;;  %p55_p4 = scmp.eq.s32.totalorder %s52_s27, 0 }
  0x53   : > { %p1551_p0 = por %p1915_p12, %p70_p2  ;;  %s836_s10 = sshll.u32 %s266_s4, 3 }
  0x54   : > { %p1917_p8 = scmp.lt.s32.totalorder %s1333_s17, 146  ;;  %s270_s6 = scalar_lea.vmem [#allocation5], %s836_s10 }
  0x55   : > { %s1916_s7 = scalar_select %p1551_p0, 1, 0 }
  0x56   : > { %p1559_p5 = pnand %p1917_p8, %p66_p7  ;;  %p1920_p9 = pmov %p1917_p8 }
  0x57   : > { %s1566_s15 = scalar_select %p55_p4, %s1321_s14, %s57_s11  }
  0x58   : > { %s876_s2 = scalar_select %p66_p7, [#allocation4], [#allocation14] }
  0x59   : > { %1919 = sst [smem:[#allocation33_spill]] %s1566_s15  ;;  %p1921_p10 = pmov %p1917_p8 }
  0x5a   : > { %s877_s24 = scalar_select %p66_p7, %s1329_s16, 0 }
  0x5b   : > { %s1991_s2 = smov (!%p1920_p9, %s876_s2), [#allocation17]  ;;  %s281_s9 = sshll.u32 %s270_s6, 4  ;;  %s1573_s9 = int_to_ptr.vmem [resolvable:$true] %s281_s9 }
  0x5c   : > { %s1993_s24 = smov (!%p1921_p10, %s877_s24), 0  ;;  %s1576_s20 = sld [smem:[#allocation4 + %s1329_s16]] }
  0x5d   : > { %s271_s26 = sld [smem:[%s1991_s2 + %s1993_s24]]  ;;  %p154_p11 = scmp.ne.s32.totalorder %s1297_s8, %s1293_s0 }
  0x5e   : > { %s1579_s25 = sld [smem:[#allocation4 + %s1985_s19]]  ;;  %p1923_p3 = pmov %p1914_p6 }
  0x5f   : > { %s1922_s1 = sld [smem:[#allocation34_spill]]  ;;  %s267_s2 = scalar_lea.sflag [#allocation6], %s266_s4 }
  0x60   : > { %p1592_p1 = por %p154_p11, %p1923_p3  ;;  %p1085_p6 = pneg %p1559_p5 }
  0x62   : > { %s1924_s10 = scalar_select %p1592_p1, 1, 0 }
  0x63   : > { %s869_s11 = sshll.u32 %s271_s26, 7 }
  0x65   : > { %s279_s3 = scalar_lea.hbm %s1922_s1, %s869_s11  ;;  %s1088_s26 = scalar_lea.hbm %s1922_s1, 256 }
  0x66   : > { %s1083_s24 = scalar_lea.hbm %s279_s3, 128  ;;  %p1089_p4 = scmp.lt.s32.totalorder %s279_s3, %s1922_s1 }
  0x67   : > { %p1084_p2 = scmp.ne.s32.totalorder %s279_s3, %s1083_s24  ;;  %p1090_p8 = scmp.lt.s32.totalorder %s1088_s26, %s1083_s24 }
  0x69   : > { %p1086_p7 = pnand %p1085_p6, %p1084_p2  ;;  %p1091_p9 = por %p1090_p8, %p1089_p4 }
  0x6b   : > { %p1087_p12 = pneg %p1086_p7 }
  0x6d   : > { %p1092_p10 = pnand %p1091_p9, %p1087_p12 }
  0x6f   : > { %1095 = shalt.err (!%p1092_p10)
}
  0x70   : > { %s1096_s4 = scalar_lea.vmem %s1573_s9, 128  ;;  %s1337_s11 = smov [#allocation5]  }
  0x71   : > { %p1097_p11 = scmp.ne.s32.totalorder %s1573_s9, %s1096_s4  ;;  %s1101_s23 = sshll.u32 %s1337_s11, 4  ;;  %s1102_s23 = int_to_ptr.vmem [resolvable:$false] %s1101_s23 }
  0x72   : > { %s1103_s22 = scalar_lea.vmem %s1102_s23, 256  ;;  %p1104_p7 = scmp.lt.s32.totalorder %s1573_s9, %s1102_s23 }
  0x73   : > { %p1099_p3 = pnand %p1097_p11, %p1085_p6  ;;  %p1105_p13 = scmp.lt.s32.totalorder %s1103_s22, %s1096_s4 }
  0x75   : > { %p1100_p2 = pneg %p1099_p3  ;;  %p1106_p0 = por %p1105_p13, %p1104_p7 }
  0x77   : > { %p1107_p1 = pnand %p1106_p0, %p1100_p2 }
  0x79   : > { %1110 = shalt.err (!%p1107_p1)
}
  0x7a   : > { %897 = dma.hbm_to_vmem [thread:$0]  (!%p1559_p5), %s279_s3, 128, %s1573_s9, %s267_s2  }
  0x7b   : > { %p1925_p0 = scmp.eq.s32.totalorder %s1459_s18, 0  ;;  %p1926_p13 = scmp.ne.s32.totalorder %s1293_s0, %s1289_s30 }
  0x7c   : > { %s1928_s15 = sand.u32 1, %s1297_s8   ;;  %s142_s27 = ssub.s32 %s1576_s20, %s1579_s25 }
  0x7d   : > { %p1615_p1 = por %p1926_p13, %p1925_p0  ;;  %s842_s21 = sshll.u32 %s1928_s15, 2 }
  0x7e   : > { %p145_p6 = scmp.eq.s32.totalorder %s142_s27, 0  ;;  %s329_s24 = scalar_lea.vmem [#allocation10], %s842_s21 }
  0x7f   : > { %s1927_s12 = scalar_select %p1615_p1, 1, 0 }
  0x80   : > { %s340_s6 = sshll.u32 %s329_s24, 4  ;;  %p1929_p12 = scmp.ne.s32.totalorder %s1924_s10, 0  ;;  %s1637_s6 = int_to_ptr.vmem [resolvable:$true] %s340_s6 }
  0x81   : > { %s1930_s26 = sld [smem:[#allocation26_spill]]  ;;  %s1931_s30 = sadd.s32 1, %s1297_s8 }
  0x82   : > { %s882_s3 = scalar_select %p1929_p12, [#allocation4], [#allocation16] }
  0x83   : > { %s1628_s9 = scalar_select %p145_p6, %s1297_s8, %s1931_s30  }
  0x84   : > { %s883_s2 = scalar_select %p1929_p12, %s1329_s16, 0 }
  0x85   : > { %p1932_p5 = scmp.lt.s32.totalorder %s1333_s17, 146  ;;  %s170_s11 = ssub.s32 %s1329_s16, %s1985_s19 }
  0x86   : > { %p1650_p10 = scmp.eq.s32.totalorder %s170_s11, 0  ;;  %s175_s22 = sadd.s32 1, %s1285_s29 }
  0x87   : > { %s1995_s3 = smov (!%p1932_p5, %s882_s3), [#allocation19]  ;;  %p1933_p4 = pmov %p1932_p5 }
  0x88   : > { %s1936_s23 = scalar_select %p1650_p10, 1, 0 }
  0x89   : > { %s1997_s2 = smov (!%p1933_p4, %s883_s2), 0  ;;  %p1934_p8 = pmov %p1933_p4 }
  0x8a   : > { %s330_s25 = sld [smem:[%s1995_s3 + %s1997_s2]] }
  0x8b   : > { %p1643_p9 = pnand %p1934_p8, %p1929_p12  ;;  %s1937_s24 = sld [smem:[#allocation37_spill]] }
  0x8d   : > { %p1113_p7 = pneg %p1643_p9 }
  0x90   : > { %s871_s15 = sshll.u32 %s330_s25, 6 }
  0x91   : > { %s338_s10 = scalar_lea.hbm %s1937_s24, %s871_s15  ;;  %s1116_s11 = scalar_lea.hbm %s1937_s24, 128 }
  0x92   : > { %s1111_s30 = scalar_lea.hbm %s338_s10, 64  ;;  %p1117_p6 = scmp.lt.s32.totalorder %s338_s10, %s1937_s24 }
  0x93   : > { %p1112_p2 = scmp.ne.s32.totalorder %s338_s10, %s1111_s30  ;;  %p1118_p12 = scmp.lt.s32.totalorder %s1116_s11, %s1111_s30 }
  0x95   : > { %p1114_p0 = pnand %p1113_p7, %p1112_p2  ;;  %p1119_p5 = por %p1118_p12, %p1117_p6 }
  0x97   : > { %p1115_p13 = pneg %p1114_p0 }
  0x99   : > { %p1120_p4 = pnand %p1119_p5, %p1115_p13 }
  0x9b   : > { %1123 = shalt.err (!%p1120_p4)
}
  0x9c   : > { %s1124_s25 = scalar_lea.vmem %s1637_s6, 64  ;;  %s1338_s15 = smov [#allocation10]  }
  0x9d   : > { %p1125_p8 = scmp.ne.s32.totalorder %s1637_s6, %s1124_s25  ;;  %s1129_s21 = sshll.u32 %s1338_s15, 4  ;;  %s1130_s21 = int_to_ptr.vmem [resolvable:$false] %s1129_s21 }
  0x9e   : > { %s1131_s27 = scalar_lea.vmem %s1130_s21, 128  ;;  %p1132_p0 = scmp.lt.s32.totalorder %s1637_s6, %s1130_s21 }
  0x9f   : > { %p1127_p3 = pnand %p1125_p8, %p1113_p7  ;;  %p1133_p11 = scmp.lt.s32.totalorder %s1131_s27, %s1124_s25 }
  0xa1   : > { %p1128_p2 = pneg %p1127_p3  ;;  %p1134_p1 = por %p1133_p11, %p1132_p0 }
  0xa3   : > { %p1135_p10 = pnand %p1134_p1, %p1128_p2 }
  0xa5   : > { %1138 = shalt.err (!%p1135_p10)
}
  0xa6   : > { %907 = dma.hbm_to_vmem [thread:$0]  (!%p1643_p9), %s338_s10, 64, %s1637_s6, %s1525_s5  }
  0xa7   : > { %p1938_p1 = scmp.ne.s32.totalorder %s1936_s23, 0  ;;  %p1939_p10 = scmp.eq.s32.totalorder %s1333_s17, 0 }
  0xa8   : > { %p1940_p11 = scmp.ne.s32.totalorder %s1285_s29, %s1281_s28  ;;  %p1941_p7 = scmp.eq.s32.totalorder %s1459_s18, 0 }
  0xa9   : > { %s1682_s1 = scalar_select %p1938_p1, %s1285_s29, %s175_s22  }
  0xaa   : > { %p184_p3 = por %p1940_p11, %p1939_p10  ;;  %p1942_p13 = scmp.ne.s32.totalorder %s1281_s28, %s1930_s26 }
  0xab   : > { %p214_p12 = scmp.eq.s32.totalorder %s1459_s18, 145  ;;  %s1944_s4 = sadd.s32 4294967294, %s1333_s17  }
  0xac   : > { %p1694_p6 = por %p1942_p13, %p1941_p7  ;;  %p220_p5 = scmp.eq.s32.totalorder %s1944_s4, 145 }
  0xad   : > { %s347_s30 = sand.u32 1, %s1285_s29   ;;  %s872_s3 = sshll.u32 %s1329_s16, 5 }
  0xae   : > { %p1945_p4 = pmov %p1940_p11  ;;  %p1947_p8 = pmov %p1942_p13 }
  0xaf   : > { %s845_s23 = sshll.u32 %s347_s30, 1  ;;  %s1949_s2 = sld [smem:[#allocation38_spill]] }
  0xb0   : > { %p1706_p9 = por %p214_p12, %p1945_p4  ;;  %p1713_p2 = por %p220_p5, %p1947_p8 }
  0xb1   : > { %s351_s25 = scalar_lea.vmem [#allocation11], %s845_s23  ;;  %p1950_p0 = scmp.lt.s32.totalorder %s1333_s17, 146 }
  0xb2   : > { %s361_s15 = sshll.u32 %s351_s25, 4  ;;  %s348_s27 = scalar_lea.sflag [#allocation12], %s347_s30  ;;  %s362_s15 = int_to_ptr.vmem [resolvable:$true] %s361_s15 }
  0xb3   : > { %p1722_p1 = pnand %p1950_p0, %p184_p3  ;;  %s1152_s26 = scalar_lea.vmem %s362_s15, 32 }
  0xb4   : > { %p1153_p11 = scmp.ne.s32.totalorder %s362_s15, %s1152_s26  ;;  %s1339_s4 = smov [#allocation11]  }
  0xb5   : > { %s359_s11 = scalar_lea.hbm %s1949_s2, %s872_s3  ;;  %p1141_p10 = pneg %p1722_p1 }
  0xb6   : > { %s1157_s24 = sshll.u32 %s1339_s4, 4  ;;  %s1158_s24 = int_to_ptr.vmem [resolvable:$false] %s1157_s24 }
  0xb7   : > { %p1155_p7 = pnand %p1153_p11, %p1141_p10  ;;  %s1159_s3 = scalar_lea.vmem %s1158_s24, 64 }
  0xb8   : > { %p1160_p12 = scmp.lt.s32.totalorder %s362_s15, %s1158_s24  ;;  %p1161_p5 = scmp.lt.s32.totalorder %s1159_s3, %s1152_s26 }
  0xb9   : > { %p1156_p13 = pneg %p1155_p7 }
  0xba   : > { %p1162_p4 = por %p1161_p5, %p1160_p12 }
  0xbc   : > { %p1163_p3 = pnand %p1162_p4, %p1156_p13 }
  0xbe   : > { %1166 = shalt.err (!%p1163_p3)
}
  0xbf   : > { %910 = dma.hbm_to_vmem [thread:$0]  (!%p1722_p1), %s359_s11, 32, %s362_s15, %s348_s27  }
  0xc0   : > { %s1952_s23 = sld [smem:[#allocation32_spill]] }
  0xc6   : > { %p1953_p8 = scmp.ne.s32.totalorder %s1952_s23, 0 }
  0xc7   : > { %s372_s30 = sand.u32 (!%p1953_p8), 1, %s1317_s13   ;;  %p1954_p0 = scmp.ne.s32.totalorder (!%p1953_p8), %s1916_s7, 0 }
  0xc8   : > { %370 = sbr.rel (%p1953_p8) target bundleno = 453 (0x1c5), region = 40  ;;  %s1733_s22 = sshll.u32 (!%p1953_p8), %s372_s30, 3 }
  0xc9   : > { %s373_s10 = scalar_lea.sflag (!%p1953_p8), [#allocation6], %s372_s30  ;;  %s376_s2 = scalar_lea.vmem (!%p1953_p8), [#allocation5], %s1733_s22 }
  0xcd   : > { %1256 = dma.done.wait (%p1954_p0), %s373_s10, 128  }
  0xce   : > { %1258 = vsyncadd (%p1954_p0), %s373_s10, 4294967168  ;;  %s1955_s24 = sld [smem:[#allocation27_spill]]  ;;  %s381_s11 = sand.u32 1, %s1459_s18  }
  0xcf   : > { %s1956_s25 = sld [smem:[#allocation30_spill]]  ;;  %s382_s27 = scalar_lea.sflag [#allocation9], %s381_s11 }
  0xd4   : > { %s383_s15 = sand.u32 1, %s1955_s24  }
  0xd5   : > { %s850_s21 = sshll.u32 %s383_s15, 1  ;;  %p1957_p1 = scmp.ne.s32.totalorder %s1956_s25, 0 }
  0xd6   : > { %s385_s26 = scalar_lea.vmem [#allocation8], %s850_s21 }
  0xd7   : > { %1260 = dma.done.wait (%p1957_p1), %s382_s27, 32  }
  0xd8   : > { %1262 = vsyncadd (%p1957_p1), %s382_s27, 4294967264  ;;  %s392_s4 = sand.u32 1, %s1293_s0   ;;  %p1958_p10 = scmp.ne.s32.totalorder %s1927_s12, 0 }
  0xd9   : > { %s1747_s3 = sshll.u32 %s392_s4, 2 }
  0xda   : > { %s394_s7 = scalar_lea.vmem [#allocation10], %s1747_s3 }
  0xdb   : > { %1264 = dma.done.wait (%p1958_p10), %s382_s27, 64  }
  0xdc   : > { %1266 = vsyncadd (%p1958_p10), %s382_s27, 4294967232  ;;  %s1755_s18 = sand.u32 1, %s1281_s28  }
  0xdd   : > { %s852_s23 = sshll.u32 %s1755_s18, 1  ;;  %s400_s30 = scalar_lea.sflag [#allocation12], %s1755_s18 }
  0xde   : > { %s403_s10 = scalar_lea.vmem [#allocation11], %s852_s23 }
  0xdf   : > { %1268 = dma.done.wait (%p1694_p6), %s400_s30, 32  }
  0xe0   : > { %1270 = vsyncadd (%p1694_p6), %s400_s30, 4294967264  ;;  %s1959_s24 = sld [smem:[#allocation29_spill]]  ;;  %v496_v0 = vlaneseq  ;;  %v1340_v1 = vmov 0.0   ;;  %v493_v4 = vld [vmem:[%s403_s10] sm:$0x1]  ;;  %vm550_vm0 = vcmask 1043456  }
  0xe1   : > { %492 = vst [vmem:[#allocation2 + $0x8] sm:$0xff] %v1340_v1  ;;  %v509_v5 = vld [vmem:[%s385_s26] sm:$0x1]  ;;  %v858_v6 = vld [vmem:[%s403_s10 + $0x1] sm:$0x1]  ;;  %s1960_s15 = sld [smem:[#allocation35_spill]] }
  0xe2   : > { %v497_v2 = vshrl.u32 %v496_v0, 7  ;;  %v863_v7 = vld [vmem:[%s385_s26 + $0x1] sm:$0x1]  ;;  %v538_v8 = vadd.f32 %v858_v6, %v493_v4  ;;  %v510_v10 = vmul.f32 %v509_v5, %v493_v4  ;;  %v503_v13 = vld [vmem:[%s376_s2] sm:$0xf]  ;;  %vm552_vm1 = vcmask 1046528  }
  0xe3   : > { %v536_v11 = vmul.f32 %v863_v7, %v858_v6  ;;  %v861_v14 = vld [vmem:[%s376_s2 + $0x4] sm:$0xf]  ;;  %s853_s22 = sshll.u32 %s1755_s18, 2  ;;  %v494_v31 = vld [vmem:[%s394_s7] sm:$0x3]  ;;  %s1961_s30 = sld [smem:[#allocation39_spill]] }
  0xe4   : > { %v1764_v3 = vsub.s32 0, %v497_v2  ;;  %v859_v32 = vld [vmem:[%s394_s7 + $0x2] sm:$0x3]  ;;  %s454_s27 = scalar_lea.vmem [#allocation13], %s853_s22  ;;  %s1341_s3 = smov [#allocation13]  }
  0xe5   : > { %v537_v21 = vadd.f32 %v536_v11, %v510_v10  ;;  %s627_s26 = sshll.u32 %s454_s27, 4  ;;  %s1171_s7 = sshll.u32 %s1341_s3, 4  ;;  %s628_s26 = int_to_ptr.vmem [resolvable:$true] %s627_s26  ;;  %s1172_s7 = int_to_ptr.vmem [resolvable:$false] %s1171_s7 }
  0xe6   : > { %s464_s12 = sld [smem:[#allocation4 + %s1959_s24]]  ;;  %v499_v15 = vrot.slane %v493_v4, %v1764_v3  ;;  %v521_v16 = vrot.slane %v858_v6, %v1764_v3  ;;  %s875_s2 = sshll.u32 %s1959_s24, 6 }
  0xe7   : > { %v548_v26 = vrot.slane %v537_v21, %v1764_v3  ;;  %s1167_s25 = scalar_lea.vmem %s628_s26, 64  ;;  %s1173_s11 = scalar_lea.vmem %s1172_s7, 128 }
  0xe8   : > { %v540_v9 = vld [vmem:[#allocation2 + $0x8] sm:$0x1]  ;;  %v504_v17 = vmul.f32 %v503_v13, %v499_v15  ;;  %v528_v18 = vmul.f32 %v861_v14, %v521_v16  ;;  %v501_v33 = vmul.f32 %v499_v15, %v494_v31  ;;  %v523_v34 = vmul.f32 %v859_v32, %v521_v16  ;;  %p1168_p6 = scmp.ne.s32.totalorder %s628_s26, %s1167_s25  ;;  %p1174_p12 = scmp.lt.s32.totalorder %s628_s26, %s1172_s7 }
  0xe9   : > { %v555_v12 = vadd.f32 %v540_v9, %v538_v8  ;;  %s625_s10 = scalar_lea.hbm %s1961_s30, %s875_s2  ;;  %p1175_p5 = scmp.lt.s32.totalorder %s1173_s11, %s1167_s25 }
  0xea   : > { %v529_v24 = vadd.f32 %v528_v18, %v504_v17  ;;  %502 = vst [vmem:[%s454_s27] sm:$0x3] %v501_v33  ;;  %860 = vst [vmem:[%s454_s27 + $0x2] sm:$0x3] %v523_v34  ;;  %p1169_p7 = pnand %p1168_p6, %p1706_p9 }
  0xeb   : > { %557 = vst [vmem:[#allocation2 + $0x8] sm:$0x1] %v555_v12  ;;  %p1176_p4 = por %p1175_p5, %p1174_p12 }
  0xec   : > { %p466_p11 = scmp.lt.s32.totalorder %s464_s12, 1  ;;  %p1170_p13 = pneg %p1169_p7 }
  0xee   : > { %s1999_s12 = smov (!%p466_p11, %s464_s12), 1  ;;  %p1177_p3 = pnand %p1176_p4, %p1170_p13 }
  0xef   : > { %s873_s20 = sshll.u32 %s1999_s12, 3  ;;  %s606_s12 = scalar_lea.sflag [#allocation7], %s1755_s18 }
  0xf0   : > { %s473_s21 = scalar_lea.vmem %s1960_s15, %s873_s20  ;;  %s1962_s20 = smov %s1961_s30 }
  0xf1   : > { %v506_v19 = vld [vmem:[%s473_s21] sm:$0x7]  ;;  %v862_v20 = vld [vmem:[%s473_s21 + $0x4] sm:$0x7] }
  0xf2   : > { %v507_v22 = vmul.f32 %v506_v19, %v499_v15  ;;  %v532_v23 = vmul.f32 %v862_v20, %v521_v16  ;;  %v562_v27 = vld [vmem:[#allocation2 + $0x8] sm:$0xff] }
  0xf3   : > { %565 = vadd.xlane.f32.xlu0 %v562_v27 }
  0xf4   : > { %v533_v25 = vadd.f32 %v532_v23, %v507_v22 }
  0xf6   : > { %v542_v28 = vrot.slane %v533_v25, 4 }
  0xf8   : > { %v551_v29 = vsel %vm550_vm0, %v529_v24, %v542_v28 }
  0xf9   : > { %v553_v30 = vsel %vm552_vm1, %v551_v29, %v548_v26 }
  0xfa   : > { %563 = vadd.xlane.f32.xlu0 %v553_v30 }
  0xfb   : > { %1180 = shalt.err (!%p1177_p3)
}
  0xfc   : > { %s1181_s15 = scalar_lea.hbm %s625_s10, 64  ;;  %s1185_s22 = scalar_lea.hbm %s1962_s20, 9344 }
  0xfd   : > { %p1182_p8 = scmp.ne.s32.totalorder %s625_s10, %s1181_s15  ;;  %p1186_p10 = scmp.lt.s32.totalorder %s625_s10, %s1962_s20 }
  0xfe   : > { %p1187_p11 = scmp.lt.s32.totalorder %s1185_s22, %s1181_s15 }
  0xff   : > { %p1183_p0 = pnand %p1182_p8, %p1706_p9 }
 0x100   : > { %p1188_p6 = por %p1187_p11, %p1186_p10 }
 0x101   : > { %p1184_p1 = pneg %p1183_p0 }
 0x103   : > { %p1189_p7 = pnand %p1188_p6, %p1184_p1 }
 0x105   : > { %1192 = shalt.err (!%p1189_p7)
}
 0x106   : > { %890 = dma.vmem_to_hbm [thread:$0]  (%p1706_p9), %s628_s26, 64, %s625_s10, %s606_s12   ;;  %vm600_vm2 = vcmask 1040384   ;;  %vm602_vm3 = vcmask 7168  }
 0x107   : > { %p482_p13 = scmp.lt.s32.totalorder %s1959_s24, 145  ;;  %s1963_s25 = sld [smem:[#allocation40_spill]] }
 0x109   : > { %s2001_s24 = smov (!%p482_p13, %s1959_s24), 145 }
 0x10a   : > { %s874_s4 = sshll.u32 %s2001_s24, 4 }
 0x10d   : > { %s1805_s3 = scalar_lea.vmem %s1963_s25, %s874_s4 }
 0x17c   : > { %v566_v35 = vpop.xlane.xlu0 %565 }
 0x17d   : > { %1039 = vrcp.f32 %v566_v35  ;;  %v601_v36 = vsel %vm600_vm2, %v566_v35, 0.0 }
 0x17e   : > { %604 = vst.msk [vmem:[%s1805_s3 + $0x8] sm:$0xff] %vm602_vm3, %v601_v36 }
 0x183   : > { %v564_v38 = vpop.xlane.xlu0 %563 }
 0x18a   : > { %v1040_v37 = vpop.eup %1039 }
 0x18b   : > { %v572_v39 = vrot.slane %v1040_v37, %v1764_v3  ;;  %v593_v49 = vrot.slane %v1040_v37, 1 }
 0x18d   : > { %v573_v40 = vmul.f32 %v572_v39, %v564_v38  ;;  %v595_v53 = vmul.f32 %v593_v49, %v564_v38 }
 0x18f   : > { %v574_v41 = vmul.f32 %v573_v40, %v573_v40  ;;  %v596_v57 = vmul.f32 1.442695, %v595_v53 }
 0x191   : > { %v575_v42 = vsel %vm550_vm0, %v574_v41, 0.0 }
 0x192   : > { %v576_v43 = vrot.slane %v575_v42, 4 }
 0x194   : > { %v577_v44 = vadd.f32 %v576_v43, %v575_v42 }
 0x196   : > { %v578_v45 = vrot.slane %v577_v44, 2 }
 0x198   : > { %v579_v46 = vadd.f32 %v578_v45, %v577_v44 }
 0x19a   : > { %v580_v47 = vrot.slane %v579_v46, 1 }
 0x19c   : > { %v581_v48 = vadd.f32 %v580_v47, %v579_v46 }
 0x19e   : > { %1041 = vrsqrt.f32 %v581_v48  ;;  %vm584_vm4 = vcmp.eq.f32.partialorder %v581_v48, inf  ;;  %v587_v52 = vand.u32 2147483648, %v581_v48  ;;  %vm586_vm5 = vcmp.eq.f32.partialorder %v581_v48, 0.0 }
 0x1ab   : > { %v1042_v50 = vpop.eup %1041 }
 0x1ac   : > { %v583_v51 = vmul.f32 %v1042_v50, %v581_v48 }
 0x1ae   : > { %v585_v54 = vsel %vm584_vm4, %v581_v48, %v583_v51 }
 0x1af   : > { %v588_v55 = vsel %vm586_vm5, %v587_v52, %v585_v54 }
 0x1b0   : > { %v589_v56 = vmax.f32 %v588_v55, 1e-12 }
 0x1b2   : > { %1043 = vrcp.f32 %v589_v56 }
 0x1b3   : > { %1045 = vpow2.f32 %v596_v57 }
 0x1bf   : > { %v1044_v58 = vpop.eup %1043 }
 0x1c0   : > { %v591_v59 = vmul.f32 %v1044_v58, %v573_v40  ;;  %v1046_v60 = vpop.eup %1045 }
 0x1c2   : > { %v598_v61 = vsel %vm550_vm0, %v591_v59, %v573_v40 }
 0x1c3   : > { %v599_v62 = vsel %vm552_vm1, %v598_v61, %v1046_v60 }
 0x1c4   : > { %603 = vst.msk [vmem:[%s1805_s3] sm:$0xff] %vm602_vm3, %v599_v62 }
 0x1c5 PF: > { %s1964_s5 = sld [smem:[#allocation26_spill]]  ;;  %p916_p9 = scmp.ge.s32.totalorder %s1333_s17, 2 }
 0x1c7   : > { %p912_p12 = pnand %p916_p9, %p1713_p2 }
 0x1c9   : > { %p913_p5 = pneg %p912_p12 }
 0x1cb   : > { %s642_s24 = sand.u32 1, %s1964_s5  }
 0x1cc   : > { %s643_s26 = scalar_lea.sflag [#allocation7], %s642_s24 }
 0x1cd   : > { %1272 = dma.done.wait (%p913_p5), %s643_s26, 64  }
 0x1ce   : > { %1274 = vsyncadd (%p913_p5), %s643_s26, 4294967232  ;;  %s34_s17 = sadd.s32 1, %s1333_s17   ;;  %s1966_s12 = sld [smem:[#allocation27_spill]] }
 0x1cf   : > { %p1820_p4 = scmp.ge.s32.totalorder %s34_s17, 148   ;;  %s1967_s7 = sld [smem:[#allocation28_spill]] }
 0x1d0   : > { %s1968_s11 = sld [smem:[#allocation31_spill]]  ;;  %s1971_s27 = smov %s1281_s28 }
 0x1d1   : > { %s1969_s6 = sld [smem:[#allocation33_spill]]  ;;  %s1972_s28 = smov %s1285_s29 }
 0x1d2   : > { %s1973_s29 = smov %s1682_s1  ;;  %s1974_s30 = smov %s1293_s0 }
 0x1d3   : > { %s1975_s0 = smov %s1297_s8  ;;  %s1976_s8 = smov %s1628_s9 }
 0x1d4   : > { %s1977_s9 = smov %s1966_s12  ;;  %s1979_s12 = smov %s1317_s13 }
 0x1d5   : > { %s1978_s10 = smov %s1967_s7  ;;  %s1980_s13 = smov %s1321_s14 }
 0x1d6   : > { %s1982_s15 = smov %s1329_s16  ;;  %s1983_s16 = smov %s1985_s19 }
 0x1d7   : > { %s1981_s14 = smov %s1969_s6  ;;  %33 = sbr.rel (!%p1820_p4) target bundleno = 27 (0x1b), region = 151 }
 0x1dc   :  { %656 = vsyncpa [#allocation6], 1 }
 0x1dd   :  { %658 = vsyncpa [#allocation6 + $0x1], 1 }
 0x1de   :  { %659 = vsyncpa [#allocation9], 1 }
 0x1df   :  { %661 = vsyncpa [#allocation9 + $0x1], 1 }
 0x1e0   :  { %662 = vsyncpa [#allocation12], 1 }
 0x1e1   :  { %664 = vsyncpa [#allocation12 + $0x1], 1 }
 0x1e2   :  { %665 = vsyncpa [#allocation7], 1 }
 0x1e3   :  { %667 = vsyncpa [#allocation7 + $0x1], 1 }

</bundles_post_ra>
